<compile_context>
chip_gen: v7x
topology: tpu7x:2x2x1
jax: 0.10.0
libtpu: 0.0.40
codegen_flags: <defaults>
</compile_context>

<pallas_src>
import jax
import jax.numpy as jnp
from jax.experimental import pallas as pl
from jax.experimental.pallas import tpu as pltpu


def _cle_kernel(x_ref, w_ref, b_ref, o_ref):
    # x_ref: (1, 1, tile_n)   w_ref/b_ref: (e_pad, 1)   o_ref: (tile_n, e_pad)
    x = x_ref[0].astype(jnp.float32)          # (1, tile_n)  -> sublane broadcast
    w = w_ref[...].astype(jnp.float32)        # (e_pad, 1)   -> lane broadcast
    b = b_ref[...].astype(jnp.float32)        # (e_pad, 1)
    z = w * x + b                             # (e_pad, tile_n), pure VPU broadcasts
    s = z * jax.nn.sigmoid(z)                 # SiLU; transcendental on EUP slot
    o_ref[...] = s.T.astype(o_ref.dtype)      # one XLU transpose -> (tile_n, e_pad)


def continuous_label_embedding(x, weight, bias, *, tile_n=1024, out_dtype=None):
    """y[n, e] = silu(x.reshape(-1)[n] * weight[e, 0] + bias[e]).

    x: any shape; weight: (emb_dim, 1); bias: (emb_dim,).
    Returns (N, emb_dim) in `out_dtype` (defaults to x.dtype).
    """
    if out_dtype is None:
        out_dtype = x.dtype
    emb_dim = weight.shape[0]

    x_flat = x.reshape(-1)                    # no wrapper-side dtype cast
    n = x_flat.shape[0]

    # Lane-pad emb_dim to a multiple of 128 -> unmasked full-width stores.
    e_pad = pl.cdiv(emb_dim, 128) * 128
    w_col = weight.reshape(emb_dim, 1)
    b_col = bias.reshape(emb_dim, 1)
    if e_pad != emb_dim:
        w_col = jnp.pad(w_col, ((0, e_pad - emb_dim), (0, 0)))
        b_col = jnp.pad(b_col, ((0, e_pad - emb_dim), (0, 0)))

    # tile_n: multiple of 128; shrink for tiny inputs so we don't pad a handful
    # of labels out to 1024 rows.  Output block (tile_n, e_pad) double-buffered
    # stays well under default scoped VMEM on v5e/v6e/v7x at these sizes.
    tile_n = max(128, (int(tile_n) // 128) * 128)
    tile_n = min(tile_n, pl.cdiv(max(n, 1), 128) * 128)
    n_pad = pl.cdiv(n, tile_n) * tile_n
    if n_pad != n:
        x_flat = jnp.pad(x_flat, (0, n_pad - n))
    grid_n = n_pad // tile_n
    x_tiled = x_flat.reshape(grid_n, 1, tile_n)      # lane-dense x layout

    out = pl.pallas_call(
        _cle_kernel,
        out_shape=jax.ShapeDtypeStruct((n_pad, e_pad), out_dtype),
        grid_spec=pltpu.PrefetchScalarGridSpec(
            num_scalar_prefetch=0,
            grid=(grid_n,),
            in_specs=[
                pl.BlockSpec((1, 1, tile_n), lambda i: (i, 0, 0)),   # x tile
                pl.BlockSpec((e_pad, 1), lambda i: (0, 0)),          # weight (resident)
                pl.BlockSpec((e_pad, 1), lambda i: (0, 0)),          # bias (resident)
            ],
            out_specs=pl.BlockSpec((tile_n, e_pad), lambda i: (i, 0)),
        ),
        compiler_params=pltpu.CompilerParams(
            dimension_semantics=("parallel",)),   # lets v7x shard the grid over both TCs
    )(x_tiled, w_col, b_col)

    if n_pad != n:
        out = out[:n]
    if e_pad != emb_dim:
        out = out[:, :emb_dim]
    return out


def _reference(x, weight, bias):
    x_flat = x.reshape(-1, 1).astype(jnp.float32)
    z = x_flat @ weight.T.astype(jnp.float32) + bias.astype(jnp.float32)
    return z * jax.nn.sigmoid(z)


if __name__ == "__main__":
    emb_dim = 256
    key = jax.random.PRNGKey(0)
    kx, kw, kb = jax.random.split(key, 3)

    # small deterministic inputs: a batch of 8 scalar labels (shape (2, 4))
    x = jax.random.normal(kx, (2, 4), dtype=jnp.float32)

    # deterministic param init (Linear(1, emb_dim) shapes)
    weight = jax.random.normal(kw, (emb_dim, 1), dtype=jnp.float32) * 0.5
    bias = jax.random.normal(kb, (emb_dim,), dtype=jnp.float32) * 0.1

    ref = _reference(x, weight, bias)

    # f32 path (matches PyTorch module semantics exactly)
    out = continuous_label_embedding(x, weight, bias)
    out = jax.block_until_ready(out)
    assert out.shape == (8, emb_dim), out.shape
    assert out.dtype == jnp.float32, out.dtype
    assert jnp.allclose(out, ref, atol=1e-5, rtol=1e-5), "mismatch vs reference (f32)"

    # bf16-output path (halves the dominant HBM write stream; math stays f32)
    out_bf16 = continuous_label_embedding(x, weight, bias, out_dtype=jnp.bfloat16)
    out_bf16 = jax.block_until_ready(out_bf16)
    assert out_bf16.dtype == jnp.bfloat16, out_bf16.dtype
    assert jnp.allclose(out_bf16.astype(jnp.float32), ref, atol=5e-2, rtol=5e-2), \
        "mismatch vs reference (bf16)"

    print("KERNEL_OK")
</pallas_src>

<mosaic_0001>
module attributes {stable_mosaic.version = 11 : i64} {
  func.func @_cle_kernel(%arg0: i32, %arg1: memref<1x1x128xf32, #tpu.memory_space<vmem>>, %arg2: memref<256x1xf32, #tpu.memory_space<vmem>>, %arg3: memref<256x1xf32, #tpu.memory_space<vmem>>, %arg4: memref<128x256xf32, #tpu.memory_space<vmem>>) attributes {dimension_semantics = [#tpu.dimension_semantics<parallel>], iteration_bounds = array<i64: 1>, scalar_prefetch = 0 : i64, scratch_operands = 0 : i64, tpu.core_type = #tpu.core_type<tc>, window_params = [{transform_indices = @transform_0, window_bounds = array<i64: 1, 1, 128>}, {pipeline_mode = #tpu.pipeline_mode<synchronous>, transform_indices = @transform_1, window_bounds = array<i64: 256, 1>}, {pipeline_mode = #tpu.pipeline_mode<synchronous>, transform_indices = @transform_2, window_bounds = array<i64: 256, 1>}, {transform_indices = @transform_3, window_bounds = array<i64: 128, 256>}]} {
    %c0 = arith.constant 0 : index
    %c0_0 = arith.constant 0 : index
    %c0_1 = arith.constant 0 : index
    %0 = vector.load %arg1[%c0, %c0_0, %c0_1] : memref<1x1x128xf32, #tpu.memory_space<vmem>>, vector<1x1x128xf32>
    %1 = vector.shape_cast %0 : vector<1x1x128xf32> to vector<1x128xf32>
    %c0_2 = arith.constant 0 : index
    %c0_3 = arith.constant 0 : index
    %2 = vector.load %arg2[%c0_2, %c0_3] : memref<256x1xf32, #tpu.memory_space<vmem>>, vector<256x1xf32>
    %c0_4 = arith.constant 0 : index
    %c0_5 = arith.constant 0 : index
    %3 = vector.load %arg3[%c0_4, %c0_5] : memref<256x1xf32, #tpu.memory_space<vmem>>, vector<256x1xf32>
    %4 = vector.broadcast %2 : vector<256x1xf32> to vector<256x128xf32>
    %5 = vector.broadcast %1 : vector<1x128xf32> to vector<256x128xf32>
    %6 = arith.mulf %4, %5 : vector<256x128xf32>
    %7 = vector.broadcast %3 : vector<256x1xf32> to vector<256x128xf32>
    %8 = arith.addf %6, %7 : vector<256x128xf32>
    %9 = arith.negf %8 : vector<256x128xf32>
    %10 = math.exp %9 : vector<256x128xf32>
    %cst = arith.constant 1.000000e+00 : f32
    %11 = vector.broadcast %cst : f32 to vector<256x128xf32>
    %12 = arith.addf %11, %10 : vector<256x128xf32>
    %13 = arith.divf %11, %12 : vector<256x128xf32>
    %14 = arith.mulf %8, %13 : vector<256x128xf32>
    %15 = tpu.transpose %14, [1, 0] : vector<256x128xf32> -> vector<128x256xf32>
    %c0_6 = arith.constant 0 : index
    %c0_7 = arith.constant 0 : index
    %16 = vector.load %arg4[%c0_6, %c0_7] : memref<128x256xf32, #tpu.memory_space<vmem>>, vector<128x256xf32>
    tpu.vector_store %arg4[%c0_6, %c0_7], %15 {strides = array<i32>} : memref<128x256xf32, #tpu.memory_space<vmem>>, vector<128x256xf32>,
    return
  }
  func.func @transform_0(%arg0: i32) -> (i32, i32, i32) {
    %c0_i32 = arith.constant 0 : i32
    %c0_i32_0 = arith.constant 0 : i32
    %c0_i32_1 = arith.constant 0 : i32
    return %arg0, %c0_i32, %c0_i32_0 : i32, i32, i32
  }
  func.func @transform_1(%arg0: i32) -> (i32, i32) {
    %c0_i32 = arith.constant 0 : i32
    %c0_i32_0 = arith.constant 0 : i32
    %c0_i32_1 = arith.constant 0 : i32
    return %c0_i32, %c0_i32_0 : i32, i32
  }
  func.func @transform_2(%arg0: i32) -> (i32, i32) {
    %c0_i32 = arith.constant 0 : i32
    %c0_i32_0 = arith.constant 0 : i32
    %c0_i32_1 = arith.constant 0 : i32
    return %c0_i32, %c0_i32_0 : i32, i32
  }
  func.func @transform_3(%arg0: i32) -> (i32, i32) {
    %c0_i32 = arith.constant 0 : i32
    %c0_i32_0 = arith.constant 0 : i32
    return %arg0, %c0_i32 : i32, i32
  }
}

</mosaic_0001>

<bundles_post_ra>
// kernel: tpu_custom_call.1
= control target key start
LH: loop header
LB: loop body
LE: loop exit
PB: predicated region body
PF: predicated region fallthrough
CT: control target
= control target key end

     0   :  { %v997_v2 = vmov 0   ;;  %s1459_s0 = inlined_call_operand.vmem [shape: f32[1,1,128], index: 0, kind: input, shape index: {}]   ;;  %s1460_s1 = inlined_call_operand.vmem [shape: f32[256,1], index: 1, kind: input, shape index: {}]   ;;  %s1461_s2 = inlined_call_operand.vmem [shape: f32[256,1], index: 2, kind: input, shape index: {}]   ;;  %s1462_s3 = inlined_call_operand.hbm [shape: f32[128,256], index: 3, kind: output, shape index: {}]  }
   0x1   :  { %v18_v0 = vld [vmem:[%s1460_s1 + $0x10] sm:$0xff]  ;;  %v16_v1 = vld [vmem:[%s1460_s1] sm:$0xff]  ;;  %844 = vset.pattern.permute.xlu1 %v997_v2  ;;  %843 = vset.pattern.permute.xlu0 %v997_v2  ;;  %v19_v3 = vld [vmem:[%s1460_s1 + $0x18] sm:$0xff] }
   0x2   :  { %92 = vperm.xlu1 %844, %v18_v0   ;;  %82 = vperm.xlu0 %843, %v16_v1   ;;  %v17_v4 = vld [vmem:[%s1460_s1 + $0x8] sm:$0xff]  ;;  %v20_v6 = vld [vmem:[%s1460_s1 + $0x20] sm:$0xff]  ;;  %v23_v7 = vld [vmem:[%s1460_s1 + $0x38] sm:$0xff] }
   0x3   :  { %v21_v5 = vld [vmem:[%s1460_s1 + $0x28] sm:$0xff]  ;;  %v22_v8 = vld [vmem:[%s1460_s1 + $0x30] sm:$0xff]  ;;  %v24_v10 = vld [vmem:[%s1460_s1 + $0x40] sm:$0xff] }
   0x4   :  { %v25_v9 = vld [vmem:[%s1460_s1 + $0x48] sm:$0xff]  ;;  %v27_v11 = vld [vmem:[%s1460_s1 + $0x58] sm:$0xff]  ;;  %v26_v12 = vld [vmem:[%s1460_s1 + $0x50] sm:$0xff] }
   0x6   :  { %97 = vperm.xlu1 %844, %v19_v3   ;;  %87 = vperm.xlu0 %843, %v17_v4  }
   0xa   :  { %107 = vperm.xlu1 %844, %v21_v5   ;;  %102 = vperm.xlu0 %843, %v20_v6  }
   0xe   :  { %117 = vperm.xlu1 %844, %v23_v7   ;;  %112 = vperm.xlu0 %843, %v22_v8  }
  0x12   :  { %127 = vperm.xlu1 %844, %v25_v9   ;;  %122 = vperm.xlu0 %843, %v24_v10  }
  0x13   :  { %8 = vsyncpa [#allocation3], 0  ;;  %v29_v13 = vld [vmem:[%s1460_s1 + $0x68] sm:$0xff]  ;;  %v28_v14 = vld [vmem:[%s1460_s1 + $0x60] sm:$0xff] }
  0x14   :  { %v31_v15 = vld [vmem:[%s1460_s1 + $0x78] sm:$0xff]  ;;  %v30_v16 = vld [vmem:[%s1460_s1 + $0x70] sm:$0xff]  ;;  %v33_v17 = vld [vmem:[%s1460_s1 + $0x88] sm:$0xff] }
  0x15   :  { %v32_v18 = vld [vmem:[%s1460_s1 + $0x80] sm:$0xff]  ;;  %v35_v19 = vld [vmem:[%s1460_s1 + $0x98] sm:$0xff]  ;;  %v34_v20 = vld [vmem:[%s1460_s1 + $0x90] sm:$0xff] }
  0x16   :  { %137 = vperm.xlu1 %844, %v27_v11   ;;  %132 = vperm.xlu0 %843, %v26_v12   ;;  %v37_v21 = vld [vmem:[%s1460_s1 + $0xa8] sm:$0xff]  ;;  %v36_v22 = vld [vmem:[%s1460_s1 + $0xa0] sm:$0xff]  ;;  %v39_v23 = vld [vmem:[%s1460_s1 + $0xb8] sm:$0xff] }
  0x17   :  { %v38_v24 = vld [vmem:[%s1460_s1 + $0xb0] sm:$0xff]  ;;  %v41_v25 = vld [vmem:[%s1460_s1 + $0xc8] sm:$0xff]  ;;  %v40_v26 = vld [vmem:[%s1460_s1 + $0xc0] sm:$0xff] }
  0x18   :  { %v43_v27 = vld [vmem:[%s1460_s1 + $0xd8] sm:$0xff]  ;;  %v42_v28 = vld [vmem:[%s1460_s1 + $0xd0] sm:$0xff]  ;;  %v45_v29 = vld [vmem:[%s1460_s1 + $0xe8] sm:$0xff] }
  0x19   :  { %v44_v30 = vld [vmem:[%s1460_s1 + $0xe0] sm:$0xff]  ;;  %v47_v31 = vld [vmem:[%s1460_s1 + $0xf8] sm:$0xff]  ;;  %v46_v32 = vld [vmem:[%s1460_s1 + $0xf0] sm:$0xff] }
  0x1a   :  { %147 = vperm.xlu1 %844, %v29_v13   ;;  %142 = vperm.xlu0 %843, %v28_v14   ;;  %v49_v33 = vld [vmem:[%s1461_s2 + $0x8] sm:$0xff]  ;;  %v48_v34 = vld [vmem:[%s1461_s2] sm:$0xff]  ;;  %v51_v35 = vld [vmem:[%s1461_s2 + $0x18] sm:$0xff] }
  0x1b   :  { %v50_v36 = vld [vmem:[%s1461_s2 + $0x10] sm:$0xff]  ;;  %v65_v37 = vld [vmem:[%s1461_s2 + $0x88] sm:$0xff]  ;;  %v64_v38 = vld [vmem:[%s1461_s2 + $0x80] sm:$0xff] }
  0x1c   :  { %v67_v39 = vld [vmem:[%s1461_s2 + $0x98] sm:$0xff]  ;;  %v66_v40 = vld [vmem:[%s1461_s2 + $0x90] sm:$0xff]  ;;  %v68_v41 = vld [vmem:[%s1461_s2 + $0xa0] sm:$0xff] }
  0x1d   :  { %v52_v42 = vld [vmem:[%s1461_s2 + $0x20] sm:$0xff]  ;;  %v69_v43 = vld [vmem:[%s1461_s2 + $0xa8] sm:$0xff]  ;;  %v70_v45 = vld [vmem:[%s1461_s2 + $0xb0] sm:$0xff] }
  0x1e   :  { %157 = vperm.xlu1 %844, %v31_v15   ;;  %152 = vperm.xlu0 %843, %v30_v16   ;;  %v53_v44 = vld [vmem:[%s1461_s2 + $0x28] sm:$0xff]  ;;  %v54_v46 = vld [vmem:[%s1461_s2 + $0x30] sm:$0xff]  ;;  %v71_v47 = vld [vmem:[%s1461_s2 + $0xb8] sm:$0xff] }
  0x1f   :  { %v55_v48 = vld [vmem:[%s1461_s2 + $0x38] sm:$0xff]  ;;  %v72_v49 = vld [vmem:[%s1461_s2 + $0xc0] sm:$0xff]  ;;  %v73_v51 = vld [vmem:[%s1461_s2 + $0xc8] sm:$0xff] }
  0x20   :  { %v56_v50 = vld [vmem:[%s1461_s2 + $0x40] sm:$0xff]  ;;  %v57_v52 = vld [vmem:[%s1461_s2 + $0x48] sm:$0xff]  ;;  %v74_v53 = vld [vmem:[%s1461_s2 + $0xd0] sm:$0xff] }
  0x21   :  { %v58_v54 = vld [vmem:[%s1461_s2 + $0x50] sm:$0xff]  ;;  %v75_v55 = vld [vmem:[%s1461_s2 + $0xd8] sm:$0xff]  ;;  %v76_v57 = vld [vmem:[%s1461_s2 + $0xe0] sm:$0xff] }
  0x22   :  { %167 = vperm.xlu1 %844, %v33_v17   ;;  %162 = vperm.xlu0 %843, %v32_v18   ;;  %v59_v56 = vld [vmem:[%s1461_s2 + $0x58] sm:$0xff]  ;;  %v60_v58 = vld [vmem:[%s1461_s2 + $0x60] sm:$0xff]  ;;  %v77_v59 = vld [vmem:[%s1461_s2 + $0xe8] sm:$0xff] }
  0x23   :  { %v61_v60 = vld [vmem:[%s1461_s2 + $0x68] sm:$0xff]  ;;  %v78_v61 = vld [vmem:[%s1461_s2 + $0xf0] sm:$0xff]  ;;  %v79_v63 = vld [vmem:[%s1461_s2 + $0xf8] sm:$0xff] }
  0x24   :  { %v62_v62 = vld [vmem:[%s1461_s2 + $0x70] sm:$0xff]  ;;  %v63_v0 = vld [vmem:[%s1461_s2 + $0x78] sm:$0xff] }
  0x26   :  { %177 = vperm.xlu1 %844, %v35_v19   ;;  %172 = vperm.xlu0 %843, %v34_v20  }
  0x2a   :  { %187 = vperm.xlu1 %844, %v37_v21   ;;  %182 = vperm.xlu0 %843, %v36_v22  }
  0x2e   :  { %197 = vperm.xlu1 %844, %v39_v23   ;;  %192 = vperm.xlu0 %843, %v38_v24  }
  0x32   :  { %207 = vperm.xlu1 %844, %v41_v25   ;;  %202 = vperm.xlu0 %843, %v40_v26  }
  0x36   :  { %217 = vperm.xlu1 %844, %v43_v27   ;;  %212 = vperm.xlu0 %843, %v42_v28  }
  0x3a   :  { %227 = vperm.xlu1 %844, %v45_v29   ;;  %222 = vperm.xlu0 %843, %v44_v30  }
  0x3e   :  { %237 = vperm.xlu1 %844, %v47_v31   ;;  %232 = vperm.xlu0 %843, %v46_v32   ;;  %v1258_v31 = vld [vmem:[%s1459_s0] ss:$0 sm:$0xff]  ;;  %s998_s0 = smov [#allocation2]  }
  0x3f   :  { %s795_s30 = sshll.u32 %s998_s0, 4  ;;  %s796_s30 = int_to_ptr.vmem [resolvable:$true] %s795_s30 }
  0x40   :  { %s973_s4 = scalar_lea.vmem %s796_s30, 4096  ;;  %p978_p1 = scmp.lt.s32.totalorder %s796_s30, %s796_s30 }
  0x41   :  { %p974_p0 = scmp.ne.s32.totalorder %s796_s30, %s973_s4  ;;  %p979_p2 = scmp.lt.s32.totalorder %s973_s4, %s973_s4 }
  0x42   :  { %285 = vperm.xlu1 %844, %v49_v33   ;;  %280 = vperm.xlu0 %843, %v48_v34  }
  0x43   :  { %p980_p3 = por %p979_p2, %p978_p1 }
  0x45   :  { %p981_p4 = pnand %p980_p3, %p974_p0 }
  0x46   :  { %295 = vperm.xlu1 %844, %v51_v35   ;;  %290 = vperm.xlu0 %843, %v50_v36  }
  0x4a   :  { %365 = vperm.xlu1 %844, %v65_v37   ;;  %360 = vperm.xlu0 %843, %v64_v38  }
  0x4e   :  { %375 = vperm.xlu1 %844, %v67_v39   ;;  %370 = vperm.xlu0 %843, %v66_v40  }
  0x52   :  { %380 = vperm.xlu1 %844, %v68_v41   ;;  %300 = vperm.xlu0 %843, %v52_v42  }
  0x56   :  { %385 = vperm.xlu1 %844, %v69_v43   ;;  %305 = vperm.xlu0 %843, %v53_v44  }
  0x5a   :  { %390 = vperm.xlu1 %844, %v70_v45   ;;  %310 = vperm.xlu0 %843, %v54_v46  }
  0x5e   :  { %395 = vperm.xlu1 %844, %v71_v47   ;;  %315 = vperm.xlu0 %843, %v55_v48  }
  0x62   :  { %400 = vperm.xlu1 %844, %v72_v49   ;;  %320 = vperm.xlu0 %843, %v56_v50  }
  0x66   :  { %405 = vperm.xlu1 %844, %v73_v51   ;;  %325 = vperm.xlu0 %843, %v57_v52  }
  0x6a   :  { %410 = vperm.xlu1 %844, %v74_v53   ;;  %330 = vperm.xlu0 %843, %v58_v54  }
  0x6e   :  { %415 = vperm.xlu1 %844, %v75_v55   ;;  %335 = vperm.xlu0 %843, %v59_v56  }
  0x72   :  { %420 = vperm.xlu1 %844, %v76_v57   ;;  %340 = vperm.xlu0 %843, %v60_v58  }
  0x76   :  { %425 = vperm.xlu1 %844, %v77_v59   ;;  %345 = vperm.xlu0 %843, %v61_v60  }
  0x7a   :  { %430 = vperm.xlu1 %844, %v78_v61   ;;  %350 = vperm.xlu0 %843, %v62_v62  }
  0x7e   :  { %435 = vperm.xlu1 %844, %v79_v63   ;;  %355 = vperm.xlu0 %843, %v63_v0  }
  0x81   :  { %v93_v1 = vpop.permute.xlu1 %92  ;;  %v83_v2 = vpop.permute.xlu0 %82 }
  0x82   :  { %v246_v36 = vmul.f32 %v1258_v31, %v83_v2  ;;  %v248_v42 = vmul.f32 %v1258_v31, %v93_v1 }
  0x85   :  { %v98_v3 = vpop.permute.xlu1 %97  ;;  %v88_v4 = vpop.permute.xlu0 %87 }
  0x86   :  { %v247_v37 = vmul.f32 %v1258_v31, %v88_v4  ;;  %v249_v43 = vmul.f32 %v1258_v31, %v98_v3 }
  0x89   :  { %v1213_v5 = vpop.permute.xlu1 %107  ;;  %v1215_v6 = vpop.permute.xlu0 %102 }
  0x8a   :  { %v250_v3 = vmul.f32 %v1258_v31, %v1215_v6  ;;  %v251_v6 = vmul.f32 %v1258_v31, %v1213_v5 }
  0x8d   :  { %v1217_v7 = vpop.permute.xlu1 %117  ;;  %v1219_v8 = vpop.permute.xlu0 %112 }
  0x91   :  { %v1221_v9 = vpop.permute.xlu1 %127  ;;  %v1223_v10 = vpop.permute.xlu0 %122 }
  0x95   :  { %v1225_v11 = vpop.permute.xlu1 %137  ;;  %v1227_v12 = vpop.permute.xlu0 %132 }
  0x99   :  { %v1229_v13 = vpop.permute.xlu1 %147  ;;  %v1231_v14 = vpop.permute.xlu0 %142 }
  0x9d   :  { %v1233_v15 = vpop.permute.xlu1 %157  ;;  %v1235_v16 = vpop.permute.xlu0 %152 }
  0xa1   :  { %v168_v17 = vpop.permute.xlu1 %167  ;;  %v163_v18 = vpop.permute.xlu0 %162 }
  0xa2   :  { %v263_v50 = vmul.f32 %v1258_v31, %v168_v17  ;;  %v262_v51 = vmul.f32 %v1258_v31, %v163_v18 }
  0xa5   :  { %v178_v19 = vpop.permute.xlu1 %177  ;;  %v173_v20 = vpop.permute.xlu0 %172 }
  0xa6   :  { %v265_v58 = vmul.f32 %v1258_v31, %v178_v19  ;;  %v264_v59 = vmul.f32 %v1258_v31, %v173_v20 }
  0xa9   :  { %v1237_v21 = vpop.permute.xlu1 %187  ;;  %v183_v22 = vpop.permute.xlu0 %182 }
  0xaa   :  { %v266_v4 = vmul.f32 %v1258_v31, %v183_v22  ;;  %v267_v22 = vmul.f32 %v1258_v31, %v1237_v21  ;;  %v252_v21 = vmul.f32 %v1258_v31, %v1219_v8  ;;  %v253_v8 = vmul.f32 %v1258_v31, %v1217_v7 }
  0xad   :  { %v1239_v23 = vpop.permute.xlu1 %197  ;;  %v1241_v24 = vpop.permute.xlu0 %192 }
  0xb1   :  { %v1243_v25 = vpop.permute.xlu1 %207  ;;  %v1245_v26 = vpop.permute.xlu0 %202 }
  0xb5   :  { %v1247_v27 = vpop.permute.xlu1 %217  ;;  %v1249_v28 = vpop.permute.xlu0 %212 }
  0xb9   :  { %v1251_v29 = vpop.permute.xlu1 %227  ;;  %v1253_v30 = vpop.permute.xlu0 %222 }
  0xbd   :  { %v238_v32 = vpop.permute.xlu1 %237  ;;  %v233_v33 = vpop.permute.xlu0 %232 }
  0xbe   :  { %v1261_v34 = vmul.f32 %v1258_v31, %v238_v32  ;;  %v1264_v35 = vmul.f32 %v1258_v31, %v233_v33 }
  0xc1   :  { %v286_v38 = vpop.permute.xlu1 %285  ;;  %v281_v39 = vpop.permute.xlu0 %280 }
  0xc2   :  { %v1268_v40 = vadd.f32 %v286_v38, %v247_v37  ;;  %v1270_v41 = vadd.f32 %v281_v39, %v246_v36 }
  0xc4   :  { %v808_v44 = vmul.f32 -1.442695, %v1268_v40  ;;  %v807_v45 = vmul.f32 -1.442695, %v1270_v41 }
  0xc5   :  { %v296_v46 = vpop.permute.xlu1 %295  ;;  %v291_v47 = vpop.permute.xlu0 %290 }
  0xc6   :  { %845 = vpow2.f32 %v808_v44  ;;  %v1276_v48 = vadd.f32 %v296_v46, %v249_v43  ;;  %v1278_v49 = vadd.f32 %v291_v47, %v248_v42 }
  0xc7   :  { %847 = vpow2.f32 %v807_v45 }
  0xc8   :  { %v810_v52 = vmul.f32 -1.442695, %v1276_v48  ;;  %v809_v53 = vmul.f32 -1.442695, %v1278_v49 }
  0xc9   :  { %v366_v54 = vpop.permute.xlu1 %365  ;;  %v361_v55 = vpop.permute.xlu0 %360 }
  0xca   :  { %849 = vpow2.f32 %v810_v52  ;;  %v1284_v56 = vadd.f32 %v366_v54, %v263_v50  ;;  %v1286_v57 = vadd.f32 %v361_v55, %v262_v51 }
  0xcb   :  { %851 = vpow2.f32 %v809_v53  ;;  %v268_v53 = vmul.f32 %v1258_v31, %v1241_v24 }
  0xcc   :  { %v824_v60 = vmul.f32 -1.442695, %v1284_v56  ;;  %v823_v61 = vmul.f32 -1.442695, %v1286_v57 }
  0xcd   :  { %v376_v62 = vpop.permute.xlu1 %375  ;;  %v371_v63 = vpop.permute.xlu0 %370 }
  0xce   :  { %853 = vpow2.f32 %v824_v60  ;;  %v1292_v0 = vadd.f32 %v376_v62, %v265_v58  ;;  %v1294_v1 = vadd.f32 %v371_v63, %v264_v59 }
  0xcf   :  { %855 = vpow2.f32 %v823_v61 }
  0xd0   :  { %v846_v2 = vpop.eup %845  ;;  %v826_v17 = vmul.f32 -1.442695, %v1292_v0  ;;  %v825_v20 = vmul.f32 -1.442695, %v1294_v1 }
  0xd1   :  { %v848_v18 = vpop.eup %847  ;;  %v567_v19 = vadd.f32 1.0, %v846_v2  ;;  %v381_v32 = vpop.permute.xlu1 %380 }
  0xd2   :  { %v301_v33 = vpop.permute.xlu0 %300  ;;  %v566_v36 = vadd.f32 1.0, %v848_v18  ;;  %857 = vpow2.f32 %v826_v17  ;;  %v1301_v37 = vadd.f32 %v381_v32, %v266_v4 }
  0xd3   :  { %v1303_v38 = vadd.f32 %v301_v33, %v250_v3  ;;  %859 = vrcp.f32 %v567_v19  ;;  %v269_v3 = vmul.f32 %v1258_v31, %v1239_v23 }
  0xd4   :  { %v850_v39 = vpop.eup %849  ;;  %861 = vrcp.f32 %v566_v36  ;;  %v827_v42 = vmul.f32 -1.442695, %v1301_v37 }
  0xd5   :  { %v852_v43 = vpop.eup %851  ;;  %863 = vpow2.f32 %v825_v20  ;;  %v811_v44 = vmul.f32 -1.442695, %v1303_v38  ;;  %v386_v45 = vpop.permute.xlu1 %385  ;;  %v569_v52 = vadd.f32 1.0, %v850_v39  ;;  %v254_v39 = vmul.f32 %v1258_v31, %v1223_v10 }
  0xd6   :  { %v306_v46 = vpop.permute.xlu0 %305  ;;  %v568_v47 = vadd.f32 1.0, %v852_v43  ;;  %865 = vpow2.f32 %v827_v42  ;;  %v1311_v50 = vadd.f32 %v386_v45, %v267_v22  ;;  %v270_v42 = vmul.f32 %v1258_v31, %v1245_v26 }
  0xd7   :  { %v1313_v51 = vadd.f32 %v306_v46, %v251_v6 }
  0xd8   :  { %v854_v5 = vpop.eup %853  ;;  %867 = vrcp.f32 %v568_v47  ;;  %v828_v54 = vmul.f32 -1.442695, %v1311_v50 }
  0xd9   :  { %v856_v55 = vpop.eup %855  ;;  %v583_v58 = vadd.f32 1.0, %v854_v5  ;;  %869 = vpow2.f32 %v811_v44  ;;  %v812_v59 = vmul.f32 -1.442695, %v1313_v51  ;;  %v391_v60 = vpop.permute.xlu1 %390 }
  0xda   :  { %v311_v61 = vpop.permute.xlu0 %310  ;;  %v582_v62 = vadd.f32 1.0, %v856_v55  ;;  %871 = vpow2.f32 %v828_v54  ;;  %v1321_v63 = vadd.f32 %v391_v60, %v268_v53  ;;  %v271_v55 = vmul.f32 %v1258_v31, %v1243_v25 }
  0xdb   :  { %v1323_v2 = vadd.f32 %v311_v61, %v252_v21  ;;  %873 = vrcp.f32 %v569_v52  ;;  %v255_v21 = vmul.f32 %v1258_v31, %v1221_v9 }
  0xdc   :  { %v858_v24 = vpop.eup %857  ;;  %875 = vrcp.f32 %v582_v62  ;;  %v829_v4 = vmul.f32 -1.442695, %v1321_v63 }
  0xdd   :  { %v813_v17 = vmul.f32 -1.442695, %v1323_v2  ;;  %v860_v18 = vpop.eup %859  ;;  %877 = vpow2.f32 %v812_v59  ;;  %v396_v19 = vpop.permute.xlu1 %395  ;;  %v585_v6 = vadd.f32 1.0, %v858_v24 }
  0xde   :  { %v316_v20 = vpop.permute.xlu0 %315  ;;  %v862_v32 = vpop.eup %861  ;;  %879 = vrcp.f32 %v583_v58  ;;  %v1331_v33 = vadd.f32 %v396_v19, %v269_v3  ;;  %v663_v26 = vmul.f32 %v860_v18, %v1268_v40  ;;  %v256_v40 = vmul.f32 %v1258_v31, %v1227_v12 }
  0xdf   :  { %v1333_v36 = vadd.f32 %v316_v20, %v253_v8  ;;  %v864_v7 = vpop.eup %863  ;;  %v662_v23 = vmul.f32 %v862_v32, %v1270_v41  ;;  %881 = vpow2.f32 %v829_v4  ;;  %v272_v20 = vmul.f32 %v1258_v31, %v1249_v28 }
  0xe0   :  { %v866_v22 = vpop.eup %865  ;;  %v584_v43 = vadd.f32 1.0, %v864_v7  ;;  %883 = vpow2.f32 %v813_v17  ;;  %v830_v44 = vmul.f32 -1.442695, %v1331_v33 }
  0xe1   :  { %v814_v45 = vmul.f32 -1.442695, %v1333_v36  ;;  %694 = vxpose.xlu0.b32.start [1/16] %v662_v23, 128  ;;  %v401_v46 = vpop.permute.xlu1 %400  ;;  %v586_v53 = vadd.f32 1.0, %v866_v22 }
  0xe2   :  { %v321_v47 = vpop.permute.xlu0 %320  ;;  %v868_v52 = vpop.eup %867  ;;  %885 = vrcp.f32 %v584_v43  ;;  %v1342_v10 = vadd.f32 %v401_v46, %v270_v42 }
  0xe3   :  { %v1344_v41 = vadd.f32 %v321_v47, %v254_v39  ;;  %v870_v5 = vpop.eup %869  ;;  %887 = vrcp.f32 %v585_v6  ;;  %v664_v4 = vmul.f32 %v868_v52, %v1278_v49  ;;  %v257_v39 = vmul.f32 %v1258_v31, %v1225_v11 }
  0xe4   :  { %v872_v54 = vpop.eup %871  ;;  %v570_v58 = vadd.f32 1.0, %v870_v5  ;;  %889 = vpow2.f32 %v830_v44  ;;  %v831_v59 = vmul.f32 -1.442695, %v1342_v10 }
  0xe5   :  { %v874_v60 = vpop.eup %873  ;;  %891 = vpow2.f32 %v814_v45  ;;  %v815_v61 = vmul.f32 -1.442695, %v1344_v41  ;;  %695 = vxpose.xlu0.b32.cont [2/16] %v663_v26, 128  ;;  %v406_v62 = vpop.permute.xlu1 %405  ;;  %v587_v18 = vadd.f32 1.0, %v872_v54  ;;  %v273_v45 = vmul.f32 %v1258_v31, %v1247_v27 }
  0xe6   :  { %v326_v8 = vpop.permute.xlu0 %325  ;;  %v876_v9 = vpop.eup %875  ;;  %893 = vrcp.f32 %v570_v58  ;;  %v1355_v24 = vadd.f32 %v406_v62, %v271_v55  ;;  %v665_v42 = vmul.f32 %v874_v60, %v1276_v48  ;;  %v258_v27 = vmul.f32 %v1258_v31, %v1231_v14 }
  0xe7   :  { %v1357_v3 = vadd.f32 %v326_v8, %v255_v21  ;;  %v878_v25 = vpop.eup %877  ;;  %v678_v17 = vmul.f32 %v876_v9, %v1286_v57  ;;  %895 = vrcp.f32 %v586_v53  ;;  %v274_v55 = vmul.f32 %v1258_v31, %v1253_v30 }
  0xe8   :  { %v880_v19 = vpop.eup %879  ;;  %v571_v32 = vadd.f32 1.0, %v878_v25  ;;  %897 = vpow2.f32 %v831_v59  ;;  %v832_v12 = vmul.f32 -1.442695, %v1355_v24 }
  0xe9   :  { %v882_v7 = vpop.eup %881  ;;  %899 = vpow2.f32 %v815_v61  ;;  %726 = vxpose.xlu1.b32.start [1/16] %v678_v17, 128  ;;  %696 = vxpose.xlu0.b32.cont [3/16] %v664_v4, 128  ;;  %v411_v49 = vpop.permute.xlu1 %410  ;;  %v816_v6 = vmul.f32 -1.442695, %v1357_v3  ;;  %v679_v43 = vmul.f32 %v880_v19, %v1284_v56 }
  0xea   :  { %v331_v23 = vpop.permute.xlu0 %330  ;;  %v884_v57 = vpop.eup %883  ;;  %901 = vrcp.f32 %v571_v32  ;;  %v1367_v22 = vadd.f32 %v411_v49, %v272_v20  ;;  %v588_v5 = vadd.f32 1.0, %v882_v7  ;;  %v275_v32 = vmul.f32 %v1258_v31, %v1251_v29 }
  0xeb   :  { %v1369_v28 = vadd.f32 %v331_v23, %v256_v40  ;;  %903 = vrcp.f32 %v587_v18  ;;  %v572_v44 = vadd.f32 1.0, %v884_v57  ;;  %v259_v18 = vmul.f32 %v1258_v31, %v1229_v13 }
  0xec   :  { %v886_v11 = vpop.eup %885  ;;  %905 = vpow2.f32 %v832_v12  ;;  %v833_v46 = vmul.f32 -1.442695, %v1367_v22 }
  0xed   :  { %v817_v47 = vmul.f32 -1.442695, %v1369_v28  ;;  %v888_v52 = vpop.eup %887  ;;  %907 = vrcp.f32 %v572_v44  ;;  %727 = vxpose.xlu1.b32.cont [2/16] %v679_v43, 128  ;;  %697 = vxpose.xlu0.b32.cont [4/16] %v665_v42, 128  ;;  %v416_v21 = vpop.permute.xlu1 %415  ;;  %v680_v58 = vmul.f32 %v886_v11, %v1294_v1 }
  0xee   :  { %v336_v48 = vpop.permute.xlu0 %335  ;;  %v890_v26 = vpop.eup %889  ;;  %909 = vpow2.f32 %v816_v6  ;;  %v1377_v56 = vadd.f32 %v416_v21, %v273_v45  ;;  %v681_v19 = vmul.f32 %v888_v52, %v1292_v0 }
  0xef   :  { %v1379_v53 = vadd.f32 %v336_v48, %v257_v39  ;;  %v892_v54 = vpop.eup %891  ;;  %911 = vpow2.f32 %v833_v46  ;;  %v589_v40 = vadd.f32 1.0, %v890_v26 }
  0xf0   :  { %v894_v59 = vpop.eup %893  ;;  %v573_v60 = vadd.f32 1.0, %v892_v54  ;;  %913 = vpow2.f32 %v817_v47  ;;  %v834_v61 = vmul.f32 -1.442695, %v1377_v56 }
  0xf1   :  { %v818_v62 = vmul.f32 -1.442695, %v1379_v53  ;;  %v896_v8 = vpop.eup %895  ;;  %v666_v9 = vmul.f32 %v894_v59, %v1303_v38  ;;  %915 = vrcp.f32 %v588_v5  ;;  %728 = vxpose.xlu1.b32.cont [3/16] %v680_v58, 128  ;;  %v421_v14 = vpop.permute.xlu1 %420  ;;  %v261_v59 = vmul.f32 %v1258_v31, %v1233_v15 }
  0xf2   :  { %v341_v25 = vpop.permute.xlu0 %340  ;;  %v898_v4 = vpop.eup %897  ;;  %917 = vrcp.f32 %v573_v60  ;;  %v1389_v30 = vadd.f32 %v421_v14, %v274_v55  ;;  %v682_v43 = vmul.f32 %v896_v8, %v1301_v37 }
  0xf3   :  { %v1391_v1 = vadd.f32 %v341_v25, %v258_v27  ;;  %v900_v17 = vpop.eup %899  ;;  %v590_v20 = vadd.f32 1.0, %v898_v4  ;;  %919 = vpow2.f32 %v834_v61  ;;  %698 = vxpose.xlu0.b32.cont [5/16] %v666_v9, 128 }
  0xf4   :  { %v902_v38 = vpop.eup %901  ;;  %v574_v12 = vadd.f32 1.0, %v900_v17  ;;  %921 = vpow2.f32 %v818_v62  ;;  %v835_v23 = vmul.f32 -1.442695, %v1389_v30 }
  0xf5   :  { %v819_v7 = vmul.f32 -1.442695, %v1391_v1  ;;  %v904_v39 = vpop.eup %903  ;;  %v667_v49 = vmul.f32 %v902_v38, %v1313_v51  ;;  %923 = vrcp.f32 %v589_v40  ;;  %729 = vxpose.xlu1.b32.cont [4/16] %v681_v19, 128  ;;  %v426_v13 = vpop.permute.xlu1 %425  ;;  %v260_v51 = vmul.f32 %v1258_v31, %v1235_v16 }
  0xf6   :  { %v346_v0 = vpop.permute.xlu0 %345  ;;  %v906_v57 = vpop.eup %905  ;;  %925 = vrcp.f32 %v574_v12  ;;  %v1401_v6 = vadd.f32 %v426_v13, %v275_v32 }
  0xf7   :  { %v1403_v42 = vadd.f32 %v346_v0, %v259_v18  ;;  %v908_v29 = vpop.eup %907  ;;  %927 = vrcp.f32 %v590_v20  ;;  %v591_v44 = vadd.f32 1.0, %v906_v57  ;;  %699 = vxpose.xlu0.b32.cont [6/16] %v667_v49, 128 }
  0xf8   :  { %v910_v11 = vpop.eup %909  ;;  %v668_v45 = vmul.f32 %v908_v29, %v1323_v2  ;;  %929 = vpow2.f32 %v819_v7  ;;  %v836_v46 = vmul.f32 -1.442695, %v1401_v6  ;;  %v683_v2 = vmul.f32 %v904_v39, %v1311_v50 }
  0xf9   :  { %v912_v47 = vpop.eup %911  ;;  %v575_v52 = vadd.f32 1.0, %v910_v11  ;;  %931 = vpow2.f32 %v835_v23  ;;  %730 = vxpose.xlu1.b32.cont [5/16] %v682_v43, 128  ;;  %v431_v5 = vpop.permute.xlu1 %430  ;;  %v820_v37 = vmul.f32 -1.442695, %v1403_v42 }
  0xfa   :  { %v351_v21 = vpop.permute.xlu0 %350  ;;  %v914_v48 = vpop.eup %913  ;;  %933 = vrcp.f32 %v591_v44  ;;  %v1412_v26 = vadd.f32 %v431_v5, %v1264_v35  ;;  %v592_v27 = vadd.f32 1.0, %v912_v47 }
  0xfb   :  { %v1414_v54 = vadd.f32 %v351_v21, %v260_v51  ;;  %v916_v16 = vpop.eup %915  ;;  %935 = vrcp.f32 %v575_v52  ;;  %v576_v55 = vadd.f32 1.0, %v914_v48  ;;  %700 = vxpose.xlu0.b32.cont [7/16] %v668_v45, 128 }
  0xfc   :  { %v918_v58 = vpop.eup %917  ;;  %937 = vpow2.f32 %v836_v46  ;;  %v837_v60 = vmul.f32 -1.442695, %v1412_v26  ;;  %v684_v31 = vmul.f32 %v916_v16, %v1321_v63 }
  0xfd   :  { %v920_v61 = vpop.eup %919  ;;  %v669_v35 = vmul.f32 %v918_v58, %v1333_v36  ;;  %939 = vrcp.f32 %v576_v55  ;;  %731 = vxpose.xlu1.b32.cont [6/16] %v683_v2, 128  ;;  %v436_v62 = vpop.permute.xlu1 %435  ;;  %v821_v50 = vmul.f32 -1.442695, %v1414_v54 }
  0xfe   :  { %v356_v8 = vpop.permute.xlu0 %355  ;;  %v922_v9 = vpop.eup %921  ;;  %941 = vpow2.f32 %v820_v37  ;;  %v1423_v40 = vadd.f32 %v436_v62, %v1261_v34  ;;  %v593_v25 = vadd.f32 1.0, %v920_v61 }
  0xff   :  { %v1425_v14 = vadd.f32 %v356_v8, %v261_v59  ;;  %v924_v15 = vpop.eup %923  ;;  %943 = vrcp.f32 %v592_v27  ;;  %v577_v4 = vadd.f32 1.0, %v922_v9  ;;  %701 = vxpose.xlu0.b32.cont [8/16] %v669_v35, 128 }
 0x100   :  { %v926_v36 = vpop.eup %925  ;;  %945 = vpow2.f32 %v837_v60  ;;  %v838_v17 = vmul.f32 -1.442695, %v1423_v40  ;;  %v685_v63 = vmul.f32 %v924_v15, %v1331_v33 }
 0x101   :  { %v928_v18 = vpop.eup %927  ;;  %v670_v19 = vmul.f32 %v926_v36, %v1344_v41  ;;  %947 = vrcp.f32 %v577_v4  ;;  %732 = vxpose.xlu1.b32.cont [7/16] %v684_v31, 128  ;;  %v822_v20 = vmul.f32 -1.442695, %v1425_v14 }
 0x102   :  { %v930_v34 = vpop.eup %929  ;;  %949 = vpow2.f32 %v821_v50  ;;  %v686_v13 = vmul.f32 %v928_v18, %v1342_v10 }
 0x103   :  { %v932_v38 = vpop.eup %931  ;;  %951 = vrcp.f32 %v593_v25  ;;  %v578_v32 = vadd.f32 1.0, %v930_v34  ;;  %702 = vxpose.xlu0.b32.cont [9/16] %v670_v19, 128 }
 0x104   :  { %v934_v12 = vpop.eup %933  ;;  %953 = vpow2.f32 %v838_v17  ;;  %v594_v49 = vadd.f32 1.0, %v932_v38 }
 0x105   :  { %v936_v7 = vpop.eup %935  ;;  %955 = vrcp.f32 %v578_v32  ;;  %733 = vxpose.xlu1.b32.cont [8/16] %v685_v63, 128  ;;  %v687_v51 = vmul.f32 %v934_v12, %v1355_v24 }
 0x106   :  { %v938_v39 = vpop.eup %937  ;;  %v671_v41 = vmul.f32 %v936_v7, %v1357_v3  ;;  %957 = vpow2.f32 %v822_v20 }
 0x107   :  { %v940_v23 = vpop.eup %939  ;;  %959 = vrcp.f32 %v594_v49  ;;  %v595_v44 = vadd.f32 1.0, %v938_v39 }
 0x108   :  { %v942_v0 = vpop.eup %941  ;;  %v672_v57 = vmul.f32 %v940_v23, %v1369_v28  ;;  %703 = vxpose.xlu0.b32.cont [10/16] %v671_v41, 128 }
 0x109   :  { %v944_v33 = vpop.eup %943  ;;  %v579_v29 = vadd.f32 1.0, %v942_v0  ;;  %734 = vxpose.xlu1.b32.cont [9/16] %v686_v13, 128 }
 0x10a   :  { %v946_v43 = vpop.eup %945  ;;  %v688_v5 = vmul.f32 %v944_v33, %v1367_v22 }
 0x10b   :  { %v948_v11 = vpop.eup %947  ;;  %961 = vrcp.f32 %v579_v29  ;;  %v596_v28 = vadd.f32 1.0, %v946_v43 }
 0x10c   :  { %v950_v3 = vpop.eup %949  ;;  %v673_v45 = vmul.f32 %v948_v11, %v1379_v53  ;;  %704 = vxpose.xlu0.b32.cont [11/16] %v672_v57, 128  ;;  %963 = vrcp.f32 %v595_v44 }
 0x10d   :  { %v952_v46 = vpop.eup %951  ;;  %v580_v10 = vadd.f32 1.0, %v950_v3  ;;  %735 = vxpose.xlu1.b32.cont [10/16] %v687_v51, 128 }
 0x10e   :  { %v954_v47 = vpop.eup %953  ;;  %v689_v53 = vmul.f32 %v952_v46, %v1377_v56 }
 0x10f   :  { %v956_v52 = vpop.eup %955  ;;  %965 = vrcp.f32 %v580_v10  ;;  %v597_v37 = vadd.f32 1.0, %v954_v47 }
 0x110   :  { %v958_v21 = vpop.eup %957  ;;  %v674_v48 = vmul.f32 %v956_v52, %v1391_v1  ;;  %705 = vxpose.xlu0.b32.cont [12/16] %v673_v45, 128  ;;  %967 = vrcp.f32 %v596_v28 }
 0x111   :  { %v581_v24 = vadd.f32 1.0, %v958_v21  ;;  %736 = vxpose.xlu1.b32.cont [11/16] %v688_v5, 128  ;;  %v960_v16 = vpop.eup %959 }
 0x112   :  { %v690_v22 = vmul.f32 %v960_v16, %v1389_v30 }
 0x113   :  { %969 = vrcp.f32 %v581_v24 }
 0x114   :  { %706 = vxpose.xlu0.b32.cont [13/16] %v674_v48, 128  ;;  %971 = vrcp.f32 %v597_v37 }
 0x115   :  { %v962_v2 = vpop.eup %961  ;;  %737 = vxpose.xlu1.b32.cont [12/16] %v689_v53, 128 }
 0x116   :  { %v675_v27 = vmul.f32 %v962_v2, %v1403_v42  ;;  %v964_v55 = vpop.eup %963 }
 0x117   :  { %v691_v59 = vmul.f32 %v964_v55, %v1401_v6 }
 0x118   :  { %707 = vxpose.xlu0.b32.cont [14/16] %v675_v27, 128 }
 0x119   :  { %v966_v1 = vpop.eup %965  ;;  %738 = vxpose.xlu1.b32.cont [13/16] %v690_v22, 128 }
 0x11a   :  { %v676_v58 = vmul.f32 %v966_v1, %v1414_v54  ;;  %v968_v60 = vpop.eup %967 }
 0x11b   :  { %v692_v35 = vmul.f32 %v968_v60, %v1412_v26 }
 0x11c   :  { %708 = vxpose.xlu0.b32.cont [15/16] %v676_v58, 128 }
 0x11d   :  { %v970_v56 = vpop.eup %969  ;;  %739 = vxpose.xlu1.b32.cont [14/16] %v691_v59, 128 }
 0x11e   :  { %v677_v61 = vmul.f32 %v970_v56, %v1425_v14  ;;  %v972_v42 = vpop.eup %971 }
 0x11f   :  { %v693_v30 = vmul.f32 %v972_v42, %v1423_v40 }
 0x120   :  { %709 = vxpose.xlu0.b32.end [16/16] %v677_v61, 128 }
 0x121   :  { %740 = vxpose.xlu1.b32.cont [15/16] %v692_v35, 128 }
 0x125   :  { %741 = vxpose.xlu1.b32.end [16/16] %v693_v30, 128 }
 0x164   :  { %v710_v62 = vpop.trf.xlu0 }
 0x165   :  { %758 = vst [vmem:[#allocation2] sm:$0xff] %v710_v62 }
 0x168   :  { %v711_v8 = vpop.trf.xlu0 }
 0x169   :  { %v742_v54 = vpop.trf.xlu1  ;;  %760 = vst [vmem:[#allocation2 + $0x10] sm:$0xff] %v711_v8 }
 0x16a   :  { %759 = vst [vmem:[#allocation2 + $0x8] sm:$0xff] %v742_v54 }
 0x16c   :  { %v712_v6 = vpop.trf.xlu0 }
 0x16d   :  { %v743_v9 = vpop.trf.xlu1  ;;  %762 = vst [vmem:[#allocation2 + $0x20] sm:$0xff] %v712_v6 }
 0x16e   :  { %761 = vst [vmem:[#allocation2 + $0x18] sm:$0xff] %v743_v9 }
 0x170   :  { %v713_v50 = vpop.trf.xlu0 }
 0x171   :  { %v744_v14 = vpop.trf.xlu1  ;;  %764 = vst [vmem:[#allocation2 + $0x30] sm:$0xff] %v713_v50 }
 0x172   :  { %763 = vst [vmem:[#allocation2 + $0x28] sm:$0xff] %v744_v14 }
 0x174   :  { %v714_v26 = vpop.trf.xlu0 }
 0x175   :  { %v745_v15 = vpop.trf.xlu1  ;;  %766 = vst [vmem:[#allocation2 + $0x40] sm:$0xff] %v714_v26 }
 0x176   :  { %765 = vst [vmem:[#allocation2 + $0x38] sm:$0xff] %v745_v15 }
 0x178   :  { %v715_v40 = vpop.trf.xlu0 }
 0x179   :  { %v746_v31 = vpop.trf.xlu1  ;;  %768 = vst [vmem:[#allocation2 + $0x50] sm:$0xff] %v715_v40 }
 0x17a   :  { %767 = vst [vmem:[#allocation2 + $0x48] sm:$0xff] %v746_v31 }
 0x17c   :  { %v716_v25 = vpop.trf.xlu0 }
 0x17d   :  { %v747_v4 = vpop.trf.xlu1  ;;  %770 = vst [vmem:[#allocation2 + $0x60] sm:$0xff] %v716_v25 }
 0x17e   :  { %769 = vst [vmem:[#allocation2 + $0x58] sm:$0xff] %v747_v4 }
 0x180   :  { %v717_v36 = vpop.trf.xlu0 }
 0x181   :  { %v748_v17 = vpop.trf.xlu1  ;;  %772 = vst [vmem:[#allocation2 + $0x70] sm:$0xff] %v717_v36 }
 0x182   :  { %771 = vst [vmem:[#allocation2 + $0x68] sm:$0xff] %v748_v17 }
 0x184   :  { %v718_v18 = vpop.trf.xlu0 }
 0x185   :  { %v749_v19 = vpop.trf.xlu1  ;;  %774 = vst [vmem:[#allocation2 + $0x80] sm:$0xff] %v718_v18 }
 0x186   :  { %773 = vst [vmem:[#allocation2 + $0x78] sm:$0xff] %v749_v19 }
 0x188   :  { %v719_v34 = vpop.trf.xlu0 }
 0x189   :  { %v750_v20 = vpop.trf.xlu1  ;;  %776 = vst [vmem:[#allocation2 + $0x90] sm:$0xff] %v719_v34 }
 0x18a   :  { %775 = vst [vmem:[#allocation2 + $0x88] sm:$0xff] %v750_v20 }
 0x18c   :  { %v720_v38 = vpop.trf.xlu0 }
 0x18d   :  { %v751_v63 = vpop.trf.xlu1  ;;  %778 = vst [vmem:[#allocation2 + $0xa0] sm:$0xff] %v720_v38 }
 0x18e   :  { %777 = vst [vmem:[#allocation2 + $0x98] sm:$0xff] %v751_v63 }
 0x190   :  { %v721_v32 = vpop.trf.xlu0 }
 0x191   :  { %v752_v12 = vpop.trf.xlu1  ;;  %780 = vst [vmem:[#allocation2 + $0xb0] sm:$0xff] %v721_v32 }
 0x192   :  { %779 = vst [vmem:[#allocation2 + $0xa8] sm:$0xff] %v752_v12 }
 0x194   :  { %v722_v7 = vpop.trf.xlu0 }
 0x195   :  { %v753_v39 = vpop.trf.xlu1  ;;  %782 = vst [vmem:[#allocation2 + $0xc0] sm:$0xff] %v722_v7 }
 0x196   :  { %781 = vst [vmem:[#allocation2 + $0xb8] sm:$0xff] %v753_v39 }
 0x198   :  { %v723_v41 = vpop.trf.xlu0 }
 0x199   :  { %v754_v49 = vpop.trf.xlu1  ;;  %784 = vst [vmem:[#allocation2 + $0xd0] sm:$0xff] %v723_v41 }
 0x19a   :  { %783 = vst [vmem:[#allocation2 + $0xc8] sm:$0xff] %v754_v49 }
 0x19c   :  { %v724_v23 = vpop.trf.xlu0 }
 0x19d   :  { %v755_v13 = vpop.trf.xlu1  ;;  %786 = vst [vmem:[#allocation2 + $0xe0] sm:$0xff] %v724_v23 }
 0x19e   :  { %785 = vst [vmem:[#allocation2 + $0xd8] sm:$0xff] %v755_v13 }
 0x1a0   :  { %v725_v0 = vpop.trf.xlu0 }
 0x1a1   :  { %v756_v57 = vpop.trf.xlu1  ;;  %788 = vst [vmem:[#allocation2 + $0xf0] sm:$0xff] %v725_v0 }
 0x1a2   :  { %787 = vst [vmem:[#allocation2 + $0xe8] sm:$0xff] %v756_v57 }
 0x1a5   :  { %v757_v33 = vpop.trf.xlu1 }
 0x1a6   :  { %789 = vst [vmem:[#allocation2 + $0xf8] sm:$0xff] %v757_v33 }
 0x1a7   :  { %984 = shalt.err (!%p981_p4)
}
 0x1a8   :  { %s985_s7 = scalar_lea.hbm %s1462_s3, 4096 }
 0x1a9   :  { %p986_p5 = scmp.ne.s32.totalorder %s1462_s3, %s985_s7  ;;  %p989_p6 = scmp.lt.u32.totalorder %s985_s7, %s1462_s3 }
 0x1ab   :  { %p991_p7 = pnand %p989_p6, %p986_p5 }
 0x1ad   :  { %994 = shalt.err (!%p991_p7)
}
 0x1ae   :  { %s999_s12 = smov 256   ;;  %s1000_s13 = smov 16  }
 0x1af   :  { %801 = dma.vmem_to_hbm [thread:$0]  %s796_s30, 4096, %s1462_s3, [#allocation3], %s999_s12, %s999_s12, %s1000_s13  }
 0x1b0   :  { %995 = dma.done.wait [#allocation3], 4096  }
 0x1b1   :  { %996 = vsyncadd [#allocation3], 4294963200 }
 0x1b2   :  { %805 = vsyncpa [#allocation3], 1 }

</bundles_post_ra>
